<compile_context>
chip_gen: v7x
topology: tpu7x:2x2x1
jax: 0.10.0
libtpu: 0.0.40
codegen_flags: <defaults>
</compile_context>

<pallas_src>
import functools

import jax
import jax.numpy as jnp
from jax.experimental import pallas as pl
from jax.experimental.pallas import tpu as pltpu


def make_blurpool_filter(channels, dtype=jnp.float32):
    """Deterministic filter matching BlurPool.__init__: shape (C, 1, 3, 3)."""
    k = jnp.array([[1.0, 2.0, 1.0],
                   [2.0, 4.0, 2.0],
                   [1.0, 2.0, 1.0]], dtype=dtype)
    k = k / jnp.sum(k)
    return jnp.broadcast_to(k[None, None, :, :], (channels, 1, 3, 3))


def _blurpool_kernel(x_ref, o_ref, *, ho, w, wo):
    # x_ref : (tQ, 2W) block; row q = (plane b, output row i) holds
    #         [input row 2i (W lanes) | input row 2i+1 (W lanes)] of plane b.
    #         Blocks always contain whole planes (tQ is a multiple of ho).
    # o_ref : (tQ, Wo) output block.
    tq = x_ref.shape[0]
    f32 = jnp.float32

    # Slices are consumed straight from the ref (no full-block f32 pre-upcast).
    even = x_ref[:, 0:w].astype(f32)        # input rows 2i
    odd = x_ref[:, w:2 * w].astype(f32)     # input rows 2i+1

    # Vertical 3-tap [1, 2, 1], stride 2, zero top pad (per plane):
    #   v[q] = x[2i-1] + 2*x[2i] + x[2i+1] = odd[q-1] + 2*even[q] + odd[q]
    # odd[q-1] must be zeroed on each plane's first output row.
    shifted = pltpu.roll(odd, shift=1, axis=0)
    row = jax.lax.broadcasted_iota(jnp.int32, (tq, w), 0)
    if (ho & (ho - 1)) == 0:                # power-of-two fast path (bitwise and)
        first_row = (row & (ho - 1)) == 0
    else:
        first_row = (row % ho) == 0
    odd_up = jnp.where(first_row, 0.0, shifted)
    v = 2.0 * even + odd + odd_up           # (tQ, W) f32

    # Horizontal 3-tap [1, 2, 1]/16, stride 2, zero left pad, as one MXU matmul.
    # s[c, j] = {2 if c == 2j, 1 if c == 2j +- 1, else 0} / 16  (taps baked in).
    c = jax.lax.broadcasted_iota(jnp.int32, (w, wo), 0)
    j = jax.lax.broadcasted_iota(jnp.int32, (w, wo), 1)
    d = c - 2 * j
    s = (jnp.where(d == 0, 2.0, 0.0)
         + jnp.where((d == 1) | (d == -1), 1.0, 0.0)) * (1.0 / 16.0)

    out = jnp.dot(v, s.astype(f32),
                  preferred_element_type=f32,
                  precision=jax.lax.Precision.HIGHEST)   # (tQ, Wo), f32-accurate
    o_ref[...] = out.astype(o_ref.dtype)


def _round_up(n, m):
    return -(-n // m) * m


def _block_vmem_bytes(tb, ho, w, wo, dtype):
    """Conservative VMEM footprint for one grid step (tile-padded, dbl-buffered)."""
    item = jnp.dtype(dtype).itemsize
    sub = 8 if item >= 4 else 8 * (4 // item)      # f32 -> 8 sublanes, bf16 -> 16
    tq = tb * ho
    rows_in = _round_up(max(tq, 1), sub)
    r32 = _round_up(max(tq, 1), 8)
    in_blk = rows_in * _round_up(2 * w, 128) * item
    out_blk = rows_in * _round_up(wo, 128) * item
    # in-kernel f32 temporaries: even/odd/shift-or-v (~3x) + matmul accumulator
    tmps = 3 * r32 * _round_up(w, 128) * 4 + r32 * _round_up(wo, 128) * 4
    return 2 * (in_blk + out_blk) + tmps           # 2x: pipeline double buffering


def _pick_plane_tile(b, ho, w, wo, dtype, budget_bytes, min_steps=4):
    """Largest divisor of B that fits the VMEM budget, preferring >= min_steps grid
    steps so v7x's two TensorCores both get pipelined (>= 2 steps each) work."""
    fitting = [d for d in range(b, 0, -1)
               if b % d == 0 and _block_vmem_bytes(d, ho, w, wo, dtype) <= budget_bytes]
    if not fitting:
        return 1
    for d in fitting:                              # descending: largest first
        if b // d >= min_steps:
            return d
    return fitting[0]                              # B too small for min_steps


def blurpool(x_nchw):
    """BlurPool forward: F.conv2d(x, fixed_blur_filter, stride=2, padding=1, groups=C).

    x_nchw: (N, C, H, W).  Returns (N, C, Ho, Wo) in x's dtype (f32 accumulation).
    """
    n, c, h, w = x_nchw.shape
    ho = (h - 1) // 2 + 1
    wo = (w - 1) // 2 + 1

    # Odd H/W: append one zero row/col (equivalent to the conv's zero padding) so
    # the free row-pairing reshape below applies.  No-op for the common even case.
    pad_h = 2 * ho - h
    pad_w = 2 * wo - w
    if pad_h or pad_w:
        x_nchw = jnp.pad(x_nchw, ((0, 0), (0, 0), (0, pad_h), (0, pad_w)))
    he, we = h + pad_h, w + pad_w
    b = n * c

    # Free (contiguous) reshape: row q = (plane, output row), lanes = [row 2i | row 2i+1].
    x2 = x_nchw.reshape(b * ho, 2 * we)

    # Per-generation VMEM budget (v5e/v6e: 128 MiB physical; v7x: 64 MiB per TC).
    try:
        vmem_cap = int(getattr(pltpu.get_tpu_info(), "vmem_capacity_bytes",
                               64 * 1024 * 1024))
    except Exception:  # noqa: BLE001 - conservative fallback if introspection fails
        vmem_cap = 64 * 1024 * 1024
    budget = (vmem_cap * 3) // 8                   # 48 MiB on 128-MiB parts, 24 MiB on v7x

    tb = _pick_plane_tile(b, ho, we, wo, x2.dtype, budget)
    tq = tb * ho
    grid = (b // tb,)
    est = _block_vmem_bytes(tb, ho, we, wo, x2.dtype)
    vmem_limit = int(min(vmem_cap * 17 // 20,
                         max(est + (16 << 20), 32 << 20)))

    kern = functools.partial(_blurpool_kernel, ho=ho, w=we, wo=wo)

    out2 = pl.pallas_call(
        kern,
        out_shape=jax.ShapeDtypeStruct((b * ho, wo), x_nchw.dtype),
        grid=grid,
        in_specs=[pl.BlockSpec((tq, 2 * we), lambda q: (q, 0))],
        out_specs=pl.BlockSpec((tq, wo), lambda q: (q, 0)),
        compiler_params=pltpu.CompilerParams(
            dimension_semantics=("parallel",),
            vmem_limit_bytes=vmem_limit),
    )(x2)

    return out2.reshape(n, c, ho, wo)              # free reshape back to NCHW


if __name__ == "__main__":
    N, C, H, W = 2, 4, 16, 16
    key = jax.random.PRNGKey(0)
    x = jax.random.normal(key, (N, C, H, W), dtype=jnp.float32)

    out = jax.block_until_ready(jax.jit(blurpool)(x))

    # Reference check against XLA's grouped conv (same semantics as F.conv2d).
    filt = make_blurpool_filter(C)
    ref = jax.lax.conv_general_dilated(
        x, filt, window_strides=(2, 2), padding=((1, 1), (1, 1)),
        dimension_numbers=("NCHW", "OIHW", "NCHW"), feature_group_count=C)

    assert out.shape == (N, C, H // 2, W // 2), out.shape
    max_err = float(jnp.max(jnp.abs(out - ref)))
    assert jnp.allclose(out, ref, atol=1e-5, rtol=1e-5), max_err

    print("KERNEL_OK")
</pallas_src>

<mosaic_0001>
module attributes {stable_mosaic.version = 11 : i64} {
  func.func @_blurpool_kernel(%arg0: i32, %arg1: memref<16x32xf32, #tpu.memory_space<vmem>>, %arg2: memref<16x8xf32, #tpu.memory_space<vmem>>) attributes {dimension_semantics = [#tpu.dimension_semantics<parallel>], iteration_bounds = array<i64: 4>, scalar_prefetch = 0 : i64, scratch_operands = 0 : i64, tpu.core_type = #tpu.core_type<tc>, window_params = [{transform_indices = @transform_0, window_bounds = array<i64: 16, 32>}, {transform_indices = @transform_1, window_bounds = array<i64: 16, 8>}]} {
    %c0 = arith.constant 0 : index
    %c0_0 = arith.constant 0 : index
    %0 = vector.load %arg1[%c0, %c0_0] : memref<16x32xf32, #tpu.memory_space<vmem>>, vector<16x16xf32>
    %c0_1 = arith.constant 0 : index
    %c16 = arith.constant 16 : index
    %1 = vector.load %arg1[%c0_1, %c16] : memref<16x32xf32, #tpu.memory_space<vmem>>, vector<16x16xf32>
    %c1_i32 = arith.constant 1 : i32
    %2 = tpu.dynamic_rotate %1 by %c1_i32 dim 0 : vector<16x16xf32>, i32 -> vector<16x16xf32>
    %3 = tpu.iota {dimensions = array<i32: 0>} : vector<16x16xi32>
    %c7_i32 = arith.constant 7 : i32
    %4 = vector.broadcast %c7_i32 : i32 to vector<16x16xi32>
    %5 = arith.andi %3, %4 : vector<16x16xi32>
    %c0_i32 = arith.constant 0 : i32
    %6 = vector.broadcast %c0_i32 : i32 to vector<16x16xi32>
    %7 = arith.cmpi eq, %5, %6 : vector<16x16xi32>
    %cst = arith.constant 0.000000e+00 : f32
    %8 = vector.broadcast %cst : f32 to vector<16x16xf32>
    %9 = arith.select %7, %8, %2 : vector<16x16xi1>, vector<16x16xf32>
    %cst_2 = arith.constant 2.000000e+00 : f32
    %10 = vector.broadcast %cst_2 : f32 to vector<16x16xf32>
    %11 = arith.mulf %10, %0 : vector<16x16xf32>
    %12 = arith.addf %11, %1 : vector<16x16xf32>
    %13 = arith.addf %12, %9 : vector<16x16xf32>
    %14 = tpu.iota {dimensions = array<i32: 0>} : vector<16x8xi32>
    %15 = tpu.iota {dimensions = array<i32: 1>} : vector<16x8xi32>
    %c2_i32 = arith.constant 2 : i32
    %16 = vector.broadcast %c2_i32 : i32 to vector<16x8xi32>
    %17 = arith.muli %16, %15 : vector<16x8xi32>
    %18 = arith.subi %14, %17 : vector<16x8xi32>
    %c0_i32_3 = arith.constant 0 : i32
    %19 = vector.broadcast %c0_i32_3 : i32 to vector<16x8xi32>
    %20 = arith.cmpi eq, %18, %19 : vector<16x8xi32>
    %cst_4 = arith.constant 2.000000e+00 : f32
    %cst_5 = arith.constant 0.000000e+00 : f32
    %21 = vector.broadcast %cst_4 : f32 to vector<16x8xf32>
    %22 = vector.broadcast %cst_5 : f32 to vector<16x8xf32>
    %23 = arith.select %20, %21, %22 : vector<16x8xi1>, vector<16x8xf32>
    %c1_i32_6 = arith.constant 1 : i32
    %24 = vector.broadcast %c1_i32_6 : i32 to vector<16x8xi32>
    %25 = arith.cmpi eq, %18, %24 : vector<16x8xi32>
    %c-1_i32 = arith.constant -1 : i32
    %26 = vector.broadcast %c-1_i32 : i32 to vector<16x8xi32>
    %27 = arith.cmpi eq, %18, %26 : vector<16x8xi32>
    %28 = arith.ori %25, %27 : vector<16x8xi1>
    %cst_7 = arith.constant 1.000000e+00 : f32
    %cst_8 = arith.constant 0.000000e+00 : f32
    %29 = vector.broadcast %cst_7 : f32 to vector<16x8xf32>
    %30 = vector.broadcast %cst_8 : f32 to vector<16x8xf32>
    %31 = arith.select %28, %29, %30 : vector<16x8xi1>, vector<16x8xf32>
    %32 = arith.addf %23, %31 : vector<16x8xf32>
    %cst_9 = arith.constant 6.250000e-02 : f32
    %33 = vector.broadcast %cst_9 : f32 to vector<16x8xf32>
    %34 = arith.mulf %32, %33 : vector<16x8xf32>
    %cst_10 = arith.constant dense<0.000000e+00> : vector<16x8xf32>
    %35 = tpu.matmul %13, %34, %cst_10 {dimension_numbers = #tpu.dot_dimension_numbers<[1], [0], [0], [1], [0, 0, 1, 1], [], []>, precision = #tpu.contract_precision<fp32>} : vector<16x16xf32>, vector<16x8xf32>, vector<16x8xf32> -> vector<16x8xf32>
    %c0_11 = arith.constant 0 : index
    %c0_12 = arith.constant 0 : index
    %36 = vector.load %arg2[%c0_11, %c0_12] : memref<16x8xf32, #tpu.memory_space<vmem>>, vector<16x8xf32>
    tpu.vector_store %arg2[%c0_11, %c0_12], %35 {strides = array<i32>} : memref<16x8xf32, #tpu.memory_space<vmem>>, vector<16x8xf32>,
    return
  }
  func.func @transform_0(%arg0: i32) -> (i32, i32) {
    %c0_i32 = arith.constant 0 : i32
    %c0_i32_0 = arith.constant 0 : i32
    return %arg0, %c0_i32 : i32, i32
  }
  func.func @transform_1(%arg0: i32) -> (i32, i32) {
    %c0_i32 = arith.constant 0 : i32
    %c0_i32_0 = arith.constant 0 : i32
    return %arg0, %c0_i32 : i32, i32
  }
}

</mosaic_0001>

<bundles_post_ra>
// kernel: blurpool.1
= control target key start
LH: loop header
LB: loop body
LE: loop exit
PB: predicated region body
PF: predicated region fallthrough
CT: control target
= control target key end

     0   :  { %6 = vsyncpa [#allocation3], 0  ;;  %s1100_s0 = inlined_call_operand.vmem [shape: f32[64,32], index: 0, kind: input, shape index: {}]   ;;  %s1101_s1 = inlined_call_operand.hbm [shape: f32[64,8], index: 1, kind: output, shape index: {}]  }
   0x1   :  { %8 = vsyncpa [#allocation3 + $0x1], 0  ;;  %s992_s6 = smov 0   ;;  %s994_s7 = smov 0  }
   0x2   :  { %s996_s8 = smov 0   ;;  %s998_s9 = smov 0  }
   0x3 LB: > { %s1013_s10 = sadd.s32 4294967295, %s975_s9   ;;  %s757_s11 = sadd.s32 4294967294, %s975_s9   ;;  %s975_s9 = sphi %s998_s9, %s1107_s9   ;;  %s971_s8 = sphi %s996_s8, %s1106_s8   ;;  %s967_s7 = sphi %s994_s7, %s1105_s7   ;;  %s963_s6 = sphi %s992_s6, %s1104_s6  }
   0x4   : > { %s1017_s12 = sadd.s32 1, %s975_s9   ;;  %s47_s13 = sadd.s32 1, %s971_s8 }
   0x5   : > { %s44_s14 = ssub.s32 %s975_s9, %s1017_s12  ;;  %p57_p0 = scmp.ne.s32.totalorder %s971_s8, %s967_s7 }
   0x6   : > { %p45_p1 = scmp.eq.s32.totalorder %s44_s14, 0  ;;  %p58_p2 = scmp.eq.s32.totalorder %s1013_s10, 3 }
   0x7   : > { %p63_p3 = scmp.ne.s32.totalorder %s967_s7, %s963_s6  ;;  %p64_p4 = scmp.eq.s32.totalorder %s757_s11, 3 }
   0x8   : > { %s1028_s15 = scalar_select %p45_p1, %s971_s8, %s47_s13  }
   0x9   : > { %p1030_p5 = por %p58_p2, %p57_p0  ;;  %p1034_p6 = por %p64_p4, %p63_p3 }
   0xa   : > { %p760_p7 = scmp.ge.s32.totalorder %s975_s9, 1  ;;  %p91_p8 = scmp.lt.s32.totalorder %s975_s9, 5 }
   0xc   : > { %p92_p9 = pnand %p760_p7, %p91_p8 }
   0xd   : > { %s762_s18 = sshll.u32 (!%p92_p9), %s1013_s10, 1  ;;  %v130_v0 = vlaneseq (!%p92_p9)  ;;  %s977_s23 = smov (!%p92_p9), 112   ;;  %v978_v9 = vmov (!%p92_p9), 0.0   ;;  %vm169_vm11 = vcmask (!%p92_p9), 130048   ;;  %vm678_vm12 = vcmask (!%p92_p9), 64512  }
   0xe   : > { %95 = sbr.rel (%p92_p9) target bundleno = 408 (0x198), region = 24  ;;  %p112_p10 = scmp.lt.s32.totalorder (!%p92_p9), %s762_s18, 7 }
   0xf   : > { %v1041_v1 = vshrl.u32 (!%p92_p9), %v130_v0, 7  ;;  %v149_v2 = vand.u32 (!%p92_p9), 127, %v130_v0  ;;  %s108_s24 = sand.u32 (!%p92_p9), 1, %s967_s7   ;;  %s769_s28 = sshll.u32 (!%p92_p9), %s1013_s10, 8 }
  0x10   : > { %s761_s25 = sshll.u32 (!%p92_p9), %s108_s24, 4  ;;  %s1057_s2 = scalar_lea.hbm (!%p92_p9), %s1101_s1, %s769_s28 }
  0x11   : > { %v135_v3 = vadd.s32 (!%p92_p9), 8, %v1041_v1  ;;  %v150_v4 = vmul.u32 (!%p92_p9), 2, %v149_v2  ;;  %v136_v33 = vand.u32 (!%p92_p9), 7, %v1041_v1  ;;  %vm132_vm8 = vcmp.lt.s32.totalorder (!%p92_p9), %v1041_v1, 1  ;;  %s110_s26 = scalar_lea.vmem (!%p92_p9), [#allocation2], %s761_s25  ;;  %s1059_s3 = scalar_lea.sflag (!%p92_p9), [#allocation3], %s108_s24 }
  0x12   : > { %s695_s27 = sshll.u32 (!%p92_p9), %s110_s26, 4  ;;  %s979_s5 = smov (!%p92_p9), [#allocation2]   ;;  %s1052_s27 = int_to_ptr.vmem [resolvable:$true] %s695_s27 }
  0x13   : > { %v151_v5 = vsub.s32 (!%p92_p9), %v1041_v1, %v150_v4  ;;  %v152_v6 = vsub.s32 (!%p92_p9), %v135_v3, %v150_v4  ;;  %v137_v34 = vand.u32 (!%p92_p9), 7, %v135_v3  ;;  %vm138_vm9 = vcmp.eq.s32.totalorder (!%p92_p9), %v136_v33, 0  ;;  %s913_s4 = scalar_lea.vmem (!%p92_p9), %s1052_s27, 256  ;;  %s917_s10 = sshll.u32 (!%p92_p9), %s979_s5, 4  ;;  %s918_s10 = int_to_ptr.vmem [resolvable:$false] %s917_s10 }
  0x14   : > { %p914_p11 = scmp.ne.s32.totalorder (!%p92_p9), %s1052_s27, %s913_s4  ;;  %s919_s11 = scalar_lea.vmem (!%p92_p9), %s918_s10, 512 }
  0x15   : > { %s1109_s18 = smov (!%p112_p10, %s762_s18), 7  ;;  %vm153_vm0 = vcmp.eq.s32.totalorder %v151_v5, 0  ;;  %vm154_vm1 = vcmp.eq.s32.totalorder %v152_v6, 0  ;;  %vm157_vm2 = vcmp.eq.s32.totalorder %v151_v5, 1  ;;  %vm158_vm3 = vcmp.eq.s32.totalorder %v152_v6, 1  ;;  %p920_p0 = scmp.lt.s32.totalorder %s1052_s27, %s918_s10 }
  0x16   : > { %s763_s19 = sshll.u32 %s1109_s18, 3  ;;  %v155_v10 = vsel %vm153_vm0, 2.0, %v978_v9  ;;  %vm159_vm4 = vcmp.eq.s32.totalorder %v151_v5, 4294967295  ;;  %vm160_vm5 = vcmp.eq.s32.totalorder %v152_v6, 4294967295  ;;  %v156_v11 = vsel %vm154_vm1, 2.0, %v978_v9  ;;  %p915_p12 = pnand %p914_p11, %p1030_p5 }
  0x17   : > { %s115_s22 = scalar_lea.vmem %s1100_s0, %s763_s19  ;;  %vm161_vm6 = vmor %vm157_vm2, %vm159_vm4  ;;  %vm139_vm10 = vcmp.eq.s32.totalorder %v137_v34, 0  ;;  %p921_p1 = scmp.lt.s32.totalorder %s919_s11, %s913_s4 }
  0x18   : > { %v118_v7 = vld [vmem:[%s115_s22] sm:$0xff]  ;;  %v119_v8 = vld [vmem:[%s115_s22 + $0x8] sm:$0xff]  ;;  %vm162_vm7 = vmor %vm158_vm3, %vm160_vm5  ;;  %v163_v12 = vsel %vm161_vm6, 1.0, %v978_v9  ;;  %p916_p13 = pneg %p915_p12 }
  0x19   : > { %122 = vrot.lane.b32.xlu0 %v118_v7, %s977_s23  ;;  %v164_v13 = vsel %vm162_vm7, 1.0, %v978_v9  ;;  %v165_v14 = vadd.f32 %v163_v12, %v155_v10  ;;  %v142_v35 = vmul.f32 2.0, %v118_v7  ;;  %v143_v36 = vmul.f32 2.0, %v119_v8  ;;  %p922_p2 = por %p921_p1, %p920_p0 }
  0x1a   : > { %v166_v15 = vadd.f32 %v164_v13, %v156_v11 }
  0x1b   : > { %v167_v16 = vmul.f32 0.0625, %v165_v14  ;;  %p923_p3 = pnand %p922_p2, %p916_p13 }
  0x1c   : > { %v168_v17 = vmul.f32 0.0625, %v166_v15 }
  0x1d   : > { %124 = vrot.lane.b32.xlu0 %v119_v8, %s977_s23  ;;  %v177_v18 = vand.u32 4294901760, %v167_v16 }
  0x1e   : > { %v180_v19 = vand.u32 4294901760, %v168_v17 }
  0x1f   : > { %v265_v20 = vsub.f32 %v167_v16, %v177_v18 }
  0x20   : > { %v836_v21 = vpack.c.bf16 %v180_v19, %v177_v18  ;;  %v272_v22 = vsub.f32 %v168_v17, %v180_v19 }
  0x21   : > { %v266_v23 = vand.u32 4294901760, %v265_v20 }
  0x22   : > { %849 = vmatprep.subr.bf16.mxu0 %v836_v21  ;;  %837 = vmatprep.subr.bf16.mxu1 %v836_v21  ;;  %v273_v24 = vand.u32 4294901760, %v272_v22  ;;  %v844_v25 = vpack.c.bf16 %v272_v22, %v265_v20 }
  0x23   : > { %851 = vmatpush3.bf16.msra.mxu0 %v836_v21  ;;  %839 = vmatpush3.bf16.msra.mxu1 %v836_v21  ;;  %v267_v26 = vsub.f32 %v265_v20, %v266_v23 }
  0x24   : > { %v274_v27 = vsub.f32 %v272_v22, %v273_v24  ;;  %v852_v28 = vpack.c.bf16 %v273_v24, %v266_v23 }
  0x25   : > { %v268_v29 = vand.u32 4294901760, %v267_v26 }
  0x26   : > { %v275_v30 = vand.u32 4294901760, %v274_v27  ;;  %853 = vmatprep.subr.bf16.mxu0 %v852_v28 }
  0x28   : > { %v840_v31 = vpack.c.bf16 %v275_v30, %v268_v29 }
  0x2a   : > { %841 = vmatprep.subr.bf16.mxu1 %v840_v31 }
  0x8b   : > { %v123_v32 = vpop.permute.xlu0 %122 }
  0x8c   : > { %v128_v38 = vrot.slane %v123_v32, 7  ;;  %v144_v40 = vadd.f32 %v142_v35, %v123_v32 }
  0x8f   : > { %v125_v37 = vpop.permute.xlu0 %124 }
  0x90   : > { %v129_v39 = vrot.slane %v125_v37, 7  ;;  %v145_v43 = vadd.f32 %v143_v36, %v125_v37 }
  0x92   : > { %v133_v41 = vsel %vm132_vm8, %v128_v38, %v129_v39  ;;  %v134_v42 = vsel %vm132_vm8, %v129_v39, %v128_v38 }
  0x93   : > { %v140_v44 = vsel %vm138_vm9, 0.0, %v134_v42  ;;  %v141_v45 = vsel %vm139_vm10, 0.0, %v133_v41 }
  0x94   : > { %v146_v46 = vadd.f32 %v144_v40, %v140_v44  ;;  %v147_v47 = vadd.f32 %v145_v43, %v141_v45 }
  0x96   : > { %v171_v48 = vsel %vm169_vm11, %v146_v46, 0  ;;  %v174_v49 = vsel %vm169_vm11, %v147_v47, 0 }
  0x97   : > { %v243_v50 = vand.u32 4294901760, %v171_v48  ;;  %v253_v51 = vand.u32 4294901760, %v174_v49 }
  0x99   : > { %v254_v52 = vsub.f32 %v174_v49, %v253_v51  ;;  %v244_v53 = vsub.f32 %v171_v48, %v243_v50 }
  0x9b   : > { %v245_v54 = vand.u32 4294901760, %v244_v53  ;;  %v255_v55 = vand.u32 4294901760, %v254_v52 }
  0x9d   : > { %819 = vmatprep.mubr.f32.mxu0 %v245_v54  ;;  %v246_v56 = vsub.f32 %v244_v53, %v245_v54  ;;  %v256_v57 = vsub.f32 %v254_v52, %v255_v55 }
  0x9e   : > { %820 = vmatmul.mubr.f32.vlgmr.msra.gmra.mrb[0].mxu0 %v255_v55 }
  0x9f   : > { %826 = vmatprep.mubr.f32.mxu0 %v243_v50  ;;  %v247_v58 = vand.u32 4294901760, %v246_v56  ;;  %v257_v59 = vand.u32 4294901760, %v256_v57  ;;  %855 = vmatpush3.bf16.msra.mxu0 %v852_v28 }
  0xa0   : > { %857 = vmatprep.subr.bf16.mxu0 %v836_v21 }
  0xa1   : > { %798 = vmatprep.mubr.f32.mxu1 %v247_v58 }
  0xa2   : > { %799 = vmatmul.mubr.f32.vlgmr.msra.gmra.mrb[0].mxu1 %v257_v59 }
  0xa3   : > { %843 = vmatpush3.bf16.msra.mxu1 %v840_v31  ;;  %805 = vmatprep.mubr.f32.mxu1 %v243_v50 }
  0xa4   : > { %845 = vmatprep.subr.bf16.mxu1 %v844_v25 }
  0xa6   : > { %827 = vmatmul.mubr.f32.vlgmr.msra.gmra.mrb[0].mxu0 %v253_v51 }
  0xa7   : > { %833 = vmatprep.mubr.f32.mxu0 %v243_v50  ;;  %859 = vmatpush3.bf16.msra.mxu0 %v836_v21 }
  0xaa   : > { %806 = vmatmul.mubr.f32.vlgmr.msra.gmra.mrb[0].mxu1 %v253_v51 }
  0xab   : > { %847 = vmatpush3.bf16.msra.mxu1 %v844_v25  ;;  %812 = vmatprep.mubr.f32.mxu1 %v244_v53 }
  0xae   : > { %834 = vmatmul.mubr.f32.vlgmr.msra.gmra.mrb[0].mxu0 %v253_v51 }
  0xb2   : > { %813 = vmatmul.mubr.f32.vlgmr.msra.gmra.mrb[0].mxu1 %v254_v52 }
 0x181   : > { %v835_v60 = vpop.f32.mrb[0].mxu0 }
 0x182   : > { %v668_v61 = vpop.f32.mrb[1].mxu0 }
 0x185   : > { %v814_v62 = vpop.f32.mrb[0].mxu1 }
 0x186   : > { %v860_v63 = vadd.f32 %v835_v60, %v814_v62  ;;  %v422_v0 = vpop.f32.mrb[1].mxu1 }
 0x187   : > { %v861_v1 = vadd.f32 %v668_v61, %v422_v0 }
 0x188   : > { %680 = vst.msk [vmem:[%s110_s26 + $0x8] sm:$0xff] %vm678_vm12, %v860_v63 }
 0x189   : > { %679 = vst.msk [vmem:[%s110_s26] sm:$0xff] %vm678_vm12, %v861_v1 }
 0x18a   : > { %926 = shalt.err (!%p923_p3)
}
 0x18b   : > { %s927_s13 = scalar_lea.hbm %s1057_s2, 256  ;;  %s931_s19 = scalar_lea.hbm %s1101_s1, 1024 }
 0x18c   : > { %p928_p4 = scmp.ne.s32.totalorder %s1057_s2, %s927_s13  ;;  %p932_p9 = scmp.lt.u32.totalorder %s1057_s2, %s1101_s1 }
 0x18d   : > { %p933_p10 = scmp.lt.u32.totalorder %s931_s19, %s927_s13  ;;  %p935_p12 = scmp.lt.u32.totalorder %s927_s13, %s1057_s2 }
 0x18e   : > { %p929_p7 = pnand %p928_p4, %p1030_p5 }
 0x18f   : > { %p934_p11 = por %p933_p10, %p932_p9 }
 0x190   : > { %p930_p8 = pneg %p929_p7 }
 0x191   : > { %p936_p13 = por %p935_p12, %p934_p11 }
 0x193   : > { %p937_p0 = pnand %p936_p13, %p930_p8 }
 0x195   : > { %940 = shalt.err (!%p937_p0)
}
 0x196   : > { %s980_s22 = smov 128   ;;  %s981_s23 = smov 8  }
 0x197   : > { %870 = dma.vmem_to_hbm [thread:$0]  (%p1030_p5), %s1052_s27, 256, %s1057_s2, %s1059_s3, %s980_s22, %s980_s22, %s981_s23  }
 0x198 PF: > { %p876_p1 = scmp.ge.s32.totalorder %s975_s9, 2  ;;  %s710_s24 = sand.u32 1, %s963_s6  }
 0x199   : > { %s711_s25 = scalar_lea.sflag [#allocation3], %s710_s24 }
 0x19a   : > { %p873_p2 = pnand %p876_p1, %p1034_p6 }
 0x19c   : > { %958 = dma.done.wait (!%p873_p2), %s711_s25, 256  }
 0x19d   : > { %960 = vsyncadd (!%p873_p2), %s711_s25, 4294967040  ;;  %p11_p3 = scmp.ge.s32.totalorder %s1017_s12, 6   ;;  %s1104_s6 = smov %s967_s7 }
 0x19e   : > { %s1105_s7 = smov %s971_s8  ;;  %s1106_s8 = smov %s1028_s15 }
 0x19f   : > { %s1107_s9 = smov %s1017_s12  ;;  %13 = sbr.rel (!%p11_p3) target bundleno = 3 (0x3), region = 59 }
 0x1a6   :  { %716 = vsyncpa [#allocation3], 1 }
 0x1a7   :  { %718 = vsyncpa [#allocation3 + $0x1], 1 }

</bundles_post_ra>
